<compile_context>
chip_gen: v5e
topology: v5e:2x2
jax: 0.10.0
libtpu: 0.0.40
codegen_flags: <defaults>
</compile_context>

<pallas_src>
import jax
import jax.numpy as jnp
from jax.experimental import pallas as pl
from jax.experimental.pallas import tpu as pltpu


def _identity_kernel(x_ref, o_ref):
    # One wide, lane-dense VMEM tile copy per grid step.
    o_ref[...] = x_ref[...]


def as_it_is(x):
    """Zero-cost identity (recommended path): AsItIs.forward == x."""
    return x


def _pick_tile_rows(M, N, dtype, target_bytes=4 << 20, min_grid=4):
    """Dtype-aligned row-block size: big enough to amortize per-step overhead,
    small enough for double-buffered VMEM on every TPU generation, and leaving
    >= `min_grid` grid steps (when possible) for v7x megacore sharding."""
    itemsize = jnp.dtype(dtype).itemsize
    # f32 -> 8, bf16 -> 16, int8/fp8 -> 32 rows per packed sublane group.
    align = 8 * max(1, 4 // itemsize)
    if M <= align:
        return M  # full second-to-last dim is always a legal block size
    row_bytes = max(1, N * itemsize)
    vmem_rows = max(align, (target_bytes // row_bytes) // align * align)
    mc_rows = max(align, (-(-(-(-M // min_grid)) // align)) * align)  # ceil(ceil(M/min_grid)/align)*align
    rows = int(min(vmem_rows, mc_rows))
    return M if rows >= M else rows


def as_it_is_forward(x, *, target_block_bytes=4 << 20):
    """Identity forward pass (AsItIs.forward / AsItIs.get_features), as a
    Pallas kernel with input/output aliasing and large lane-dense blocks."""
    orig_shape = x.shape
    if x.ndim == 1:
        x2 = x.reshape(1, -1)
    else:
        x2 = x.reshape(-1, x.shape[-1])
    M, N = x2.shape

    tile_rows = _pick_tile_rows(M, N, x2.dtype, target_bytes=target_block_bytes)
    grid = (pl.cdiv(M, tile_rows),)

    y2 = pl.pallas_call(
        _identity_kernel,
        out_shape=jax.ShapeDtypeStruct((M, N), x2.dtype),
        grid=grid,
        # Full-width (lane-dense) blocks: one big contiguous DMA per step,
        # unmasked stores.
        in_specs=[pl.BlockSpec((tile_rows, N), lambda i: (i, 0))],
        out_specs=pl.BlockSpec((tile_rows, N), lambda i: (i, 0)),
        # Output aliases the input buffer: no separate output allocation.
        input_output_aliases={0: 0},
        compiler_params=pltpu.CompilerParams(
            dimension_semantics=("parallel",),
            vmem_limit_bytes=32 << 20,
        ),
    )(x2)
    return y2.reshape(orig_shape)


if __name__ == "__main__":
    key = jax.random.PRNGKey(0)
    # AsItIs has no parameters and no shape constraints; use a modest
    # (batch, hidden) input. 256 rows / 384 cols -> 4 parallel row-blocks.
    x = jax.random.normal(key, (256, 384), dtype=jnp.float32)

    y = as_it_is_forward(x)
    jax.block_until_ready(y)

    assert y.shape == x.shape and y.dtype == x.dtype
    assert bool(jnp.all(y == x))

    # Zero-cost reference path (what callers should normally use).
    assert as_it_is(x) is x

    print("KERNEL_OK")
</pallas_src>

<mosaic_0001>
module attributes {stable_mosaic.version = 11 : i64} {
  func.func @_identity_kernel(%arg0: i32, %arg1: memref<64x384xf32, #tpu.memory_space<vmem>>, %arg2: memref<64x384xf32, #tpu.memory_space<vmem>>) attributes {dimension_semantics = [#tpu.dimension_semantics<parallel>], iteration_bounds = array<i64: 4>, scalar_prefetch = 0 : i64, scratch_operands = 0 : i64, tpu.core_type = #tpu.core_type<tc>, window_params = [{transform_indices = @transform_0, window_bounds = array<i64: 64, 384>}, {transform_indices = @transform_1, window_bounds = array<i64: 64, 384>}]} {
    %c0 = arith.constant 0 : index
    %c0_0 = arith.constant 0 : index
    %0 = vector.load %arg1[%c0, %c0_0] : memref<64x384xf32, #tpu.memory_space<vmem>>, vector<64x384xf32>
    %c0_1 = arith.constant 0 : index
    %c0_2 = arith.constant 0 : index
    %1 = vector.load %arg2[%c0_1, %c0_2] : memref<64x384xf32, #tpu.memory_space<vmem>>, vector<64x384xf32>
    tpu.vector_store %arg2[%c0_1, %c0_2], %0 {strides = array<i32>} : memref<64x384xf32, #tpu.memory_space<vmem>>, vector<64x384xf32>,
    return
  }
  func.func @transform_0(%arg0: i32) -> (i32, i32) {
    %c0_i32 = arith.constant 0 : i32
    %c0_i32_0 = arith.constant 0 : i32
    return %arg0, %c0_i32 : i32, i32
  }
  func.func @transform_1(%arg0: i32) -> (i32, i32) {
    %c0_i32 = arith.constant 0 : i32
    %c0_i32_0 = arith.constant 0 : i32
    return %arg0, %c0_i32 : i32, i32
  }
}

</mosaic_0001>

<bundles_post_ra>
// kernel: tpu_custom_call.1
= control target key start
LH: loop header
LB: loop body
LE: loop exit
PB: predicated region body
PF: predicated region fallthrough
CT: control target
= control target key end

     0   :  { %6 = vsyncpa [#allocation3], 0  ;;  %s624_s0 = inlined_call_operand.hbm [shape: f32[256,384], index: 0, kind: input, shape index: {}, may-alias: {0,1}]   ;;  %s625_s1 = inlined_call_operand.hbm [shape: f32[256,384], index: 1, kind: output, shape index: {}, may-alias: {0,1}]  }
   0x1   :  { %8 = vsyncpa [#allocation3 + $0x1], 0 }
   0x2   :  { %9 = vsyncpa [#allocation4], 0 }
   0x3   :  { %11 = vsyncpa [#allocation4 + $0x1], 0  ;;  %s456_s6 = smov 0   ;;  %s458_s7 = smov 0  }
   0x4   :  { %s460_s8 = smov 0   ;;  %s462_s9 = smov 0  }
   0x5 LB: > { %s477_s10 = sadd.s32 4294967295, %s440_s9   ;;  %s278_s11 = sadd.s32 4294967294, %s440_s9   ;;  %s440_s9 = sphi %s462_s9, %s633_s9   ;;  %s436_s8 = sphi %s460_s8, %s632_s8   ;;  %s432_s7 = sphi %s458_s7, %s631_s7   ;;  %s428_s6 = sphi %s456_s6, %s630_s6  }
   0x6   : > { %s481_s12 = sadd.s32 1, %s440_s9   ;;  %s24_s13 = sadd.s32 1, %s436_s8 }
   0x7   : > { %s21_s14 = ssub.s32 %s440_s9, %s481_s12  ;;  %p31_p0 = scmp.ne.s32.totalorder %s436_s8, %s432_s7 }
   0x8   : > { %p22_p1 = scmp.eq.s32.totalorder %s21_s14, 0  ;;  %p32_p2 = scmp.eq.s32.totalorder %s440_s9, 0 }
   0x9   : > { %p37_p3 = scmp.ne.s32.totalorder %s432_s7, %s428_s6  ;;  %p38_p4 = scmp.eq.s32.totalorder %s477_s10, 0 }
   0xa   : > { %s493_s15 = scalar_select %p22_p1, %s436_s8, %s24_s13  }
   0xb   : > { %p33_p5 = por %p32_p2, %p31_p0  ;;  %p495_p6 = por %p38_p4, %p37_p3 }
   0xc   : > { %p61_p7 = scmp.eq.s32.totalorder %s477_s10, 3  ;;  %p67_p8 = scmp.eq.s32.totalorder %s278_s11, 3 }
   0xd   : > { %p306_p9 = scmp.lt.s32.totalorder %s440_s9, 4  ;;  %s87_s19 = sand.u32 1, %s436_s8  }
   0xe   : > { %p501_p10 = por %p61_p7, %p31_p0  ;;  %p505_p11 = por %p67_p8, %p37_p3 }
   0xf   : > { %s291_s20 = smul.u32 192, %s440_s9  ;;  %p514_p12 = pnand %p306_p9, %p33_p5 }
  0x10   : > { %s290_s21 = smul.u32 192, %s87_s19  ;;  %s88_s29 = scalar_lea.sflag [#allocation3], %s87_s19 }
  0x11   : > { %s97_s24 = scalar_lea.hbm %s624_s0, %s291_s20  ;;  %p348_p0 = pneg %p514_p12 }
  0x12   : > { %s98_s26 = sshll.u32 %s97_s24, 4  ;;  %s91_s27 = scalar_lea.vmem [#allocation2], %s290_s21  ;;  %s99_s26 = int_to_ptr.hbm [resolvable:$true] %s98_s26 }
  0x13   : > { %s100_s28 = sshll.u32 %s91_s27, 4  ;;  %s344_s30 = sshra.s32 %s99_s26, 4  ;;  %s101_s28 = int_to_ptr.vmem [resolvable:$true] %s100_s28  ;;  %s345_s30 = int_to_ptr.hbm [resolvable:$true] %s344_s30 }
  0x14   : > { %s346_s2 = scalar_lea.hbm %s345_s30, 192  ;;  %s351_s5 = scalar_lea.hbm %s624_s0, 768 }
  0x15   : > { %p347_p13 = scmp.ne.s32.totalorder %s345_s30, %s346_s2  ;;  %p352_p3 = scmp.lt.s32.totalorder %s345_s30, %s624_s0 }
  0x16   : > { %p353_p4 = scmp.lt.s32.totalorder %s351_s5, %s346_s2 }
  0x17   : > { %p349_p1 = pnand %p348_p0, %p347_p13 }
  0x18   : > { %p354_p5 = por %p353_p4, %p352_p3 }
  0x19   : > { %p350_p2 = pneg %p349_p1 }
  0x1b   : > { %p355_p7 = pnand %p354_p5, %p350_p2 }
  0x1d   : > { %358 = shalt.err (!%p355_p7)
}
  0x1e   : > { %s442_s14 = smov 384   ;;  %s443_s19 = smov 24  }
  0x1f   : > { %301 = dma.hbm_to_vmem [thread:$0]  (!%p514_p12), %s99_s26, 3072, %s101_s28, %s88_s29, %s442_s14, %s442_s14, %s443_s19  }
  0x20   : > { %p284_p8 = scmp.ge.s32.totalorder %s440_s9, 1  ;;  %p108_p9 = scmp.lt.s32.totalorder %s440_s9, 5 }
  0x22   : > { %p109_p13 = pnand %p284_p8, %p108_p9 }
  0x23   : > { %s531_s20 = sand.u32 (!%p109_p13), 1, %s432_s7  }
  0x24   : > { %112 = sbr.rel (%p109_p13) target bundleno = 70 (0x46), region = 24  ;;  %s115_s22 = scalar_lea.sflag (!%p109_p13), [#allocation3], %s531_s20 }
  0x25   : > { %s292_s21 = smul.u32 (!%p109_p13), 192, %s531_s20 }
  0x27   : > { %s535_s23 = scalar_lea.vmem (!%p109_p13), [#allocation2], %s292_s21 }
  0x29   : > { %419 = dma.done.wait (%p495_p6), %s115_s22, 3072  }
  0x2a   : > { %421 = vsyncadd (%p495_p6), %s115_s22, 4294964224  ;;  %v140_v0 = vld [vmem:[%s535_s23] sm:$0xff]  ;;  %v141_v1 = vld [vmem:[%s535_s23 + $0x8] sm:$0xff]  ;;  %s544_s24 = scalar_lea.vmem [#allocation5], %s292_s21  ;;  %s293_s16 = smul.u32 192, %s477_s10 }
  0x2b   : > { %v142_v2 = vld [vmem:[%s535_s23 + $0x10] sm:$0xff]  ;;  %164 = vst [vmem:[%s544_s24] sm:$0xff] %v140_v0  ;;  %v143_v3 = vld [vmem:[%s535_s23 + $0x18] sm:$0xff]  ;;  %v144_v4 = vld [vmem:[%s535_s23 + $0x20] sm:$0xff]  ;;  %s202_s10 = sshll.u32 %s544_s24, 4  ;;  %s189_s29 = scalar_lea.sflag [#allocation4], %s531_s20  ;;  %s203_s10 = int_to_ptr.vmem [resolvable:$true] %s202_s10 }
  0x2c   : > { %165 = vst [vmem:[%s544_s24 + $0x8] sm:$0xff] %v141_v1  ;;  %v145_v5 = vld [vmem:[%s535_s23 + $0x28] sm:$0xff]  ;;  %v146_v6 = vld [vmem:[%s535_s23 + $0x30] sm:$0xff]  ;;  %v147_v7 = vld [vmem:[%s535_s23 + $0x38] sm:$0xff]  ;;  %s201_s27 = scalar_lea.hbm %s625_s1, %s293_s16  ;;  %s394_s5 = scalar_lea.hbm %s625_s1, 768 }
  0x2d   : > { %166 = vst [vmem:[%s544_s24 + $0x10] sm:$0xff] %v142_v2  ;;  %v148_v8 = vld [vmem:[%s535_s23 + $0x40] sm:$0xff]  ;;  %v149_v9 = vld [vmem:[%s535_s23 + $0x48] sm:$0xff]  ;;  %v150_v10 = vld [vmem:[%s535_s23 + $0x50] sm:$0xff]  ;;  %s204_s28 = sshll.u32 %s201_s27, 4  ;;  %s205_s28 = int_to_ptr.hbm [resolvable:$true] %s204_s28 }
  0x2e   : > { %167 = vst [vmem:[%s544_s24 + $0x18] sm:$0xff] %v143_v3  ;;  %v151_v11 = vld [vmem:[%s535_s23 + $0x58] sm:$0xff]  ;;  %v152_v12 = vld [vmem:[%s535_s23 + $0x60] sm:$0xff]  ;;  %v153_v13 = vld [vmem:[%s535_s23 + $0x68] sm:$0xff]  ;;  %s388_s30 = sshra.s32 %s205_s28, 4  ;;  %s389_s30 = int_to_ptr.hbm [resolvable:$true] %s388_s30 }
  0x2f   : > { %168 = vst [vmem:[%s544_s24 + $0x20] sm:$0xff] %v144_v4  ;;  %v154_v14 = vld [vmem:[%s535_s23 + $0x70] sm:$0xff]  ;;  %v155_v15 = vld [vmem:[%s535_s23 + $0x78] sm:$0xff]  ;;  %v156_v16 = vld [vmem:[%s535_s23 + $0x80] sm:$0xff]  ;;  %s390_s2 = scalar_lea.hbm %s389_s30, 192  ;;  %p395_p1 = scmp.lt.s32.totalorder %s389_s30, %s625_s1 }
  0x30   : > { %169 = vst [vmem:[%s544_s24 + $0x28] sm:$0xff] %v145_v5  ;;  %v157_v17 = vld [vmem:[%s535_s23 + $0x88] sm:$0xff]  ;;  %v158_v18 = vld [vmem:[%s535_s23 + $0x90] sm:$0xff]  ;;  %v159_v19 = vld [vmem:[%s535_s23 + $0x98] sm:$0xff]  ;;  %p391_p6 = scmp.ne.s32.totalorder %s389_s30, %s390_s2  ;;  %p396_p2 = scmp.lt.s32.totalorder %s394_s5, %s390_s2 }
  0x31   : > { %170 = vst [vmem:[%s544_s24 + $0x30] sm:$0xff] %v146_v6  ;;  %v160_v20 = vld [vmem:[%s535_s23 + $0xa0] sm:$0xff]  ;;  %v161_v21 = vld [vmem:[%s535_s23 + $0xa8] sm:$0xff]  ;;  %v162_v22 = vld [vmem:[%s535_s23 + $0xb0] sm:$0xff] }
  0x32   : > { %171 = vst [vmem:[%s544_s24 + $0x38] sm:$0xff] %v147_v7  ;;  %v163_v23 = vld [vmem:[%s535_s23 + $0xb8] sm:$0xff]  ;;  %p392_p12 = pnand %p391_p6, %p501_p10  ;;  %p397_p3 = por %p396_p2, %p395_p1 }
  0x33   : > { %172 = vst [vmem:[%s544_s24 + $0x40] sm:$0xff] %v148_v8 }
  0x34   : > { %173 = vst [vmem:[%s544_s24 + $0x48] sm:$0xff] %v149_v9  ;;  %p393_p0 = pneg %p392_p12 }
  0x35   : > { %174 = vst [vmem:[%s544_s24 + $0x50] sm:$0xff] %v150_v10 }
  0x36   : > { %175 = vst [vmem:[%s544_s24 + $0x58] sm:$0xff] %v151_v11  ;;  %p398_p4 = pnand %p397_p3, %p393_p0 }
  0x37   : > { %176 = vst [vmem:[%s544_s24 + $0x60] sm:$0xff] %v152_v12 }
  0x38   : > { %177 = vst [vmem:[%s544_s24 + $0x68] sm:$0xff] %v153_v13 }
  0x39   : > { %178 = vst [vmem:[%s544_s24 + $0x70] sm:$0xff] %v154_v14 }
  0x3a   : > { %179 = vst [vmem:[%s544_s24 + $0x78] sm:$0xff] %v155_v15 }
  0x3b   : > { %180 = vst [vmem:[%s544_s24 + $0x80] sm:$0xff] %v156_v16 }
  0x3c   : > { %181 = vst [vmem:[%s544_s24 + $0x88] sm:$0xff] %v157_v17 }
  0x3d   : > { %182 = vst [vmem:[%s544_s24 + $0x90] sm:$0xff] %v158_v18 }
  0x3e   : > { %183 = vst [vmem:[%s544_s24 + $0x98] sm:$0xff] %v159_v19 }
  0x3f   : > { %184 = vst [vmem:[%s544_s24 + $0xa0] sm:$0xff] %v160_v20 }
  0x40   : > { %185 = vst [vmem:[%s544_s24 + $0xa8] sm:$0xff] %v161_v21 }
  0x41   : > { %186 = vst [vmem:[%s544_s24 + $0xb0] sm:$0xff] %v162_v22 }
  0x42   : > { %187 = vst [vmem:[%s544_s24 + $0xb8] sm:$0xff] %v163_v23 }
  0x43   : > { %401 = shalt.err (!%p398_p4)
}
  0x44   : > { %s444_s14 = smov 384   ;;  %s445_s19 = smov 24  }
  0x45   : > { %296 = dma.vmem_to_hbm [thread:$0]  (%p501_p10), %s203_s10, 3072, %s205_s28, %s189_s29, %s444_s14, %s444_s14, %s445_s19  }
  0x46 PF: > { %p307_p5 = scmp.ge.s32.totalorder %s440_s9, 2  ;;  %s219_s20 = sand.u32 1, %s428_s6  }
  0x47   : > { %s220_s21 = scalar_lea.sflag [#allocation4], %s219_s20 }
  0x48   : > { %p303_p7 = pnand %p307_p5, %p505_p11 }
  0x4a   : > { %p304_p8 = pneg %p303_p7 }
  0x4c   : > { %423 = dma.done.wait (%p304_p8), %s220_s21, 3072  }
  0x4d   : > { %425 = vsyncadd (%p304_p8), %s220_s21, 4294964224  ;;  %p14_p9 = scmp.ge.s32.totalorder %s481_s12, 6   ;;  %s630_s6 = smov %s432_s7 }
  0x4e   : > { %s631_s7 = smov %s436_s8  ;;  %s632_s8 = smov %s493_s15 }
  0x4f   : > { %s633_s9 = smov %s481_s12  ;;  %16 = sbr.rel (!%p14_p9) target bundleno = 5 (0x5), region = 69 }
  0x54   :  { %226 = vsyncpa [#allocation3], 1 }
  0x55   :  { %228 = vsyncpa [#allocation3 + $0x1], 1 }
  0x56   :  { %229 = vsyncpa [#allocation4], 1 }
  0x57   :  { %231 = vsyncpa [#allocation4 + $0x1], 1 }

</bundles_post_ra>
